<compile_context>
chip_gen: v7x
topology: tpu7x:2x2x1
jax: 0.10.0
libtpu: 0.0.40
codegen_flags: <defaults>
</compile_context>

<pallas_src>
import functools

import jax
import jax.numpy as jnp
from jax import lax
from jax.experimental import pallas as pl
from jax.experimental.pallas import tpu as pltpu


def lam_kernel(gamma_ref, x_ref, o_ref, *, matmul_dtype=None):
    # gamma_ref: (1,) f32 in SMEM
    # x_ref / o_ref: (Bb, L, D) tile in VMEM (Bb batch elements per grid step)
    y = x_ref[...]                                     # native dtype (Bb, L, D)
    ym = y if matmul_dtype is None else y.astype(matmul_dtype)

    # energy[b, i, j] = sum_l y[b, l, i] * y[b, l, j]   (symmetric in i, j)
    energy = lax.dot_general(
        ym, ym,
        dimension_numbers=(((1,), (1,)), ((0,), (0,))),
        preferred_element_type=jnp.float32)            # (Bb, D, D) f32

    # Row-softmax over the last axis of `energy` equals (by symmetry) the
    # softmax along axis=-2; computing along axis=-2 produces attn^T directly,
    # so the second matmul is a plain (L,K)x(K,N) contraction (no DxD
    # transpose for Mosaic to materialize).
    m = jnp.max(energy, axis=-2, keepdims=True)        # (Bb, 1, D)
    e = jnp.exp(energy - m)                            # (Bb, D, D)
    denom = jnp.sum(e, axis=-2, keepdims=True)         # (Bb, 1, D)
    inv = pl.reciprocal(denom, approx=True)            # EUP reciprocal
    attn_t = e * inv                                   # (Bb, D, D) == attn^T

    # out2[b, l, i] = sum_j y[b, l, j] * attn[b, i, j] = (y @ attn^T)[b, l, i]
    out2 = lax.dot_general(
        ym, attn_t.astype(ym.dtype),
        dimension_numbers=(((2,), (1,)), ((0,), (0,))),
        preferred_element_type=jnp.float32)            # (Bb, L, D) f32

    gamma = gamma_ref[0]
    if y.dtype == jnp.float32:
        res = gamma * out2 + y
    else:
        # Avoid keeping a full f32 copy of y live: residual add in native dtype.
        res = (gamma * out2).astype(y.dtype) + y
    o_ref[...] = res.astype(o_ref.dtype)


def _tpu_hw_info():
    """Best-effort chip query; conservative fallbacks if the query fails."""
    vmem_physical = 64 << 20   # conservative fallback (v7x per-TC VMEM)
    num_tc = 1
    try:
        info = pltpu.get_tpu_info()
        vmem_physical = int(getattr(info, "vmem_capacity_bytes", vmem_physical))
    except Exception:
        pass
    try:
        kind = jax.devices()[0].device_kind.lower()
        if "v7" in kind:           # v7x: 2 TensorCores per chip
            num_tc = 2
    except Exception:
        pass
    return vmem_physical, num_tc


def lam_module_pallas(x, gamma, *, block_b=None, matmul_dtype=None):
    """x: (B, head, num, dim), gamma: (1,) -> (B, head, num, dim) in x.dtype."""
    B, H, N, D = x.shape
    L = H * N
    # Merge contiguous (head, num) axes; keep the native dtype (no HBM upcast).
    xr = x.reshape(B, L, D)
    itemsize = x.dtype.itemsize

    vmem_physical, num_tc = _tpu_hw_info()
    vmem_budget = int(vmem_physical * 0.60)

    # Per-batch-element VMEM footprint: double-buffered in/out slabs (native
    # dtype) plus f32 intermediates (energy / e / attn^T and out2 / residual).
    per_b_bytes = 4 * L * D * itemsize + 3 * D * D * 4 + 2 * L * D * 4
    slab_b_bytes = L * D * itemsize

    if block_b is None:
        target_slab = 6 << 20      # ~4-8 MiB/step: HBM-bound, big tiles win
        bb = min(B,
                 max(1, vmem_budget // max(per_b_bytes, 1)),
                 max(1, target_slab // max(slab_b_bytes, 1)))
        # Only force >=2 grid steps on 2-TC chips AND when each half still
        # moves >= ~1 MiB; otherwise one big step (grid is a serial loop on
        # 1-TC parts and tiny DMAs just add per-step overhead).
        if num_tc >= 2 and pl.cdiv(B, bb) < 2 and (B * slab_b_bytes) // 2 >= (1 << 20):
            bb = pl.cdiv(B, 2)
        block_b = max(1, bb)

    # Snap to a divisor of B close to the target so no pad/slice HBM copies
    # are needed around this memory-bound kernel.
    best_div = 1
    for d in range(1, block_b + 1):
        if B % d == 0:
            best_div = d
    if best_div * 3 >= block_b * 2:
        block_b = best_div

    grid_b = pl.cdiv(B, block_b)
    B_pad = grid_b * block_b
    if B_pad != B:
        # TODO(synk): ragged tail could instead use a scalar-prefetched valid
        # count + masked stores; padded rows compute harmlessly and are sliced off.
        xr = jnp.pad(xr, ((0, B_pad - B), (0, 0), (0, 0)))

    vmem_est = block_b * per_b_bytes
    vmem_limit = int(min(max(2 * vmem_est, 16 << 20), int(vmem_physical * 0.65)))

    cost = pl.CostEstimate(
        flops=4 * B * L * D * D,            # two batched (L,D)x(D,D)-class matmuls
        transcendentals=B * D * D,          # exp over the energy matrix
        bytes_accessed=2 * B * L * D * itemsize)

    kernel = functools.partial(lam_kernel, matmul_dtype=matmul_dtype)

    out = pl.pallas_call(
        kernel,
        out_shape=jax.ShapeDtypeStruct((B_pad, L, D), x.dtype),
        grid=(grid_b,),
        in_specs=[
            pl.BlockSpec(memory_space=pltpu.MemorySpace.SMEM),       # gamma scalar
            pl.BlockSpec((block_b, L, D), lambda b: (b, 0, 0)),      # batch slab
        ],
        out_specs=pl.BlockSpec((block_b, L, D), lambda b: (b, 0, 0)),
        compiler_params=pltpu.CompilerParams(
            dimension_semantics=("parallel",),
            vmem_limit_bytes=vmem_limit),
        cost_estimate=cost,
    )(gamma.astype(jnp.float32), xr)

    if B_pad != B:
        out = out[:B]
    return out.reshape(B, H, N, D)


def lam_module_reference(x, gamma):
    """Pure-JAX transcription of the PyTorch forward (for validation)."""
    B, H, N, D = x.shape
    xp = jnp.transpose(x, (0, 3, 1, 2)).astype(jnp.float32)   # (B, D, H, N)
    q = xp.reshape(B, D, H * N)                                # (B, D, L)
    energy = jnp.einsum('bdl,bel->bde', q, q)                  # (B, D, D)
    attn = jax.nn.softmax(energy, axis=-1)
    out = jnp.einsum('bde,bel->bdl', attn, q)                  # (B, D, L)
    out = out.reshape(B, D, H, N)
    out = gamma[0] * out + xp
    return jnp.transpose(out, (0, 2, 3, 1)).astype(x.dtype)    # (B, H, N, D)


if __name__ == "__main__":
    key = jax.random.PRNGKey(0)
    B, H, N, D = 8, 4, 8, 32                       # (batch, head, num, dim)
    x = jax.random.normal(key, (B, H, N, D), dtype=jnp.float32)

    # nn.Parameter(torch.zeros(1)) -> shape (1,). Deterministically set to 0.5
    # (instead of 0.0) so the attention path actually contributes to the output.
    gamma = jnp.full((1,), 0.5, dtype=jnp.float32)

    out = lam_module_pallas(x, gamma)
    out = jax.block_until_ready(out)

    ref = lam_module_reference(x, gamma)
    assert out.shape == (B, H, N, D)
    # Tolerance loosened slightly vs. exact f32: the softmax denominator uses
    # the EUP approximate reciprocal (pl.reciprocal(..., approx=True)).
    assert jnp.allclose(out, ref, atol=5e-3, rtol=5e-3), (
        float(jnp.max(jnp.abs(out - ref))))

    print("KERNEL_OK")
</pallas_src>

<mosaic_0001>
module attributes {stable_mosaic.version = 11 : i64} {
  func.func @lam_kernel(%arg0: i32, %arg1: memref<1xf32, #tpu.memory_space<smem>>, %arg2: memref<8x32x32xf32, #tpu.memory_space<vmem>>, %arg3: memref<8x32x32xf32, #tpu.memory_space<vmem>>) attributes {dimension_semantics = [#tpu.dimension_semantics<parallel>], iteration_bounds = array<i64: 1>, scalar_prefetch = 0 : i64, scratch_operands = 0 : i64, tpu.core_type = #tpu.core_type<tc>, window_params = [{transform_indices = @transform_0, window_bounds = array<i64: 1>}, {transform_indices = @transform_1, window_bounds = array<i64: 8, 32, 32>}, {transform_indices = @transform_2, window_bounds = array<i64: 8, 32, 32>}]} {
    %c0 = arith.constant 0 : index
    %c0_0 = arith.constant 0 : index
    %c0_1 = arith.constant 0 : index
    %0 = vector.load %arg2[%c0, %c0_0, %c0_1] : memref<8x32x32xf32, #tpu.memory_space<vmem>>, vector<8x32x32xf32>
    %cst = arith.constant dense<0.000000e+00> : vector<8x32x32xf32>
    %1 = tpu.matmul %0, %0, %cst {dimension_numbers = #tpu.dot_dimension_numbers<[1], [1], [2], [2], [0, 0, 0, 2, 1, 2], [0], [0]>} : vector<8x32x32xf32>, vector<8x32x32xf32>, vector<8x32x32xf32> -> vector<8x32x32xf32>
    %cst_2 = arith.constant dense<0xFF800000> : vector<8x32xf32>
    %2 = vector.multi_reduction <maximumf>, %1, %cst_2 [1] : vector<8x32x32xf32> to vector<8x32xf32>
    %3 = vector.shape_cast %2 : vector<8x32xf32> to vector<8x1x32xf32>
    %4 = vector.broadcast %3 : vector<8x1x32xf32> to vector<8x32x32xf32>
    %5 = arith.subf %1, %4 : vector<8x32x32xf32>
    %6 = math.exp %5 : vector<8x32x32xf32>
    %cst_3 = arith.constant dense<0.000000e+00> : vector<8x32xf32>
    %7 = vector.multi_reduction <add>, %6, %cst_3 [1] : vector<8x32x32xf32> to vector<8x32xf32>
    %8 = vector.shape_cast %7 : vector<8x32xf32> to vector<8x1x32xf32>
    %9 = tpu.reciprocal %8 {approx = true} : vector<8x1x32xf32> -> vector<8x1x32xf32>
    %10 = vector.broadcast %9 : vector<8x1x32xf32> to vector<8x32x32xf32>
    %11 = arith.mulf %6, %10 : vector<8x32x32xf32>
    %cst_4 = arith.constant dense<0.000000e+00> : vector<8x32x32xf32>
    %12 = tpu.matmul %0, %11, %cst_4 {dimension_numbers = #tpu.dot_dimension_numbers<[2], [1], [1], [2], [0, 0, 0, 1, 1, 2], [0], [0]>} : vector<8x32x32xf32>, vector<8x32x32xf32>, vector<8x32x32xf32> -> vector<8x32x32xf32>
    %c0_5 = arith.constant 0 : index
    %13 = memref.load %arg1[%c0_5] : memref<1xf32, #tpu.memory_space<smem>>
    %14 = vector.broadcast %13 : f32 to vector<8x32x32xf32>
    %15 = arith.mulf %14, %12 : vector<8x32x32xf32>
    %16 = arith.addf %15, %0 : vector<8x32x32xf32>
    %c0_6 = arith.constant 0 : index
    %c0_7 = arith.constant 0 : index
    %c0_8 = arith.constant 0 : index
    %17 = vector.load %arg3[%c0_6, %c0_7, %c0_8] : memref<8x32x32xf32, #tpu.memory_space<vmem>>, vector<8x32x32xf32>
    tpu.vector_store %arg3[%c0_6, %c0_7, %c0_8], %16 {strides = array<i32>} : memref<8x32x32xf32, #tpu.memory_space<vmem>>, vector<8x32x32xf32>,
    return
  }
  func.func @transform_0(%arg0: i32) -> i32 {
    %c0_i32 = arith.constant 0 : i32
    %c0_i32_0 = arith.constant 0 : i32
    return %c0_i32 : i32
  }
  func.func @transform_1(%arg0: i32) -> (i32, i32, i32) {
    %c0_i32 = arith.constant 0 : i32
    %c0_i32_0 = arith.constant 0 : i32
    %c0_i32_1 = arith.constant 0 : i32
    return %arg0, %c0_i32, %c0_i32_0 : i32, i32, i32
  }
  func.func @transform_2(%arg0: i32) -> (i32, i32, i32) {
    %c0_i32 = arith.constant 0 : i32
    %c0_i32_0 = arith.constant 0 : i32
    %c0_i32_1 = arith.constant 0 : i32
    return %arg0, %c0_i32, %c0_i32_0 : i32, i32, i32
  }
}

</mosaic_0001>

<bundles_post_ra>
// kernel: tpu_custom_call.1
= control target key start
LH: loop header
LB: loop body
LE: loop exit
PB: predicated region body
PF: predicated region fallthrough
CT: control target
= control target key end

     0   :  { %8 = vsyncpa [#allocation4], 0  ;;  %s3659_s0 = inlined_call_operand.<no memory space> [shape: f32[1], index: 0, kind: input, shape index: {}]   ;;  %s3660_s1 = inlined_call_operand.hbm [shape: f32[8,32,32], index: 1, kind: input, shape index: {}]   ;;  %s3661_s2 = inlined_call_operand.hbm [shape: f32[8,32,32], index: 2, kind: output, shape index: {}]  }
   0x1   :  { %9 = vsyncpa [#allocation5], 0  ;;  %s3036_s9 = smov [#allocation3]   ;;  %s2988_s13 = scalar_lea.hbm %s3660_s1, 4096 }
   0x2   :  { %s17_s10 = sshll.u32 %s3036_s9, 4  ;;  %p2989_p0 = scmp.ne.s32.totalorder %s3660_s1, %s2988_s13  ;;  %s18_s10 = int_to_ptr.vmem [resolvable:$true] %s17_s10 }
   0x3   :  { %p2992_p1 = scmp.lt.u32.totalorder %s2988_s13, %s3660_s1 }
   0x5   :  { %p2994_p2 = pnand %p2992_p1, %p2989_p0 }
   0x7   :  { %2997 = shalt.err (!%p2994_p2)
}
   0x8   :  { %s2998_s18 = scalar_lea.vmem %s18_s10, 4096  ;;  %p3003_p4 = scmp.lt.s32.totalorder %s18_s10, %s18_s10 }
   0x9   :  { %p2999_p3 = scmp.ne.s32.totalorder %s18_s10, %s2998_s18  ;;  %p3004_p5 = scmp.lt.s32.totalorder %s2998_s18, %s2998_s18 }
   0xb   :  { %p3005_p6 = por %p3004_p5, %p3003_p4 }
   0xd   :  { %p3006_p7 = pnand %p3005_p6, %p2999_p3 }
   0xf   :  { %3009 = shalt.err (!%p3006_p7)
}
  0x10   :  { %s3037_s19 = smov 128   ;;  %s3038_s20 = smov 8  }
  0x11   :  { %23 = dma.hbm_to_vmem [thread:$0]  %s3660_s1, 4096, %s18_s10, [#allocation4], %s3037_s19, %s3037_s19, %s3038_s20  }
  0x12   :  { %3032 = dma.done.wait [#allocation4], 4096  }
  0x13   :  { %3033 = vsyncadd [#allocation4], 4294963200  ;;  %v3070_v0 = vld [vmem:[#allocation3 + $0x20] sm:$0xff]  ;;  %v32_v2 = vld [vmem:[#allocation3 + $0x28] sm:$0xff]  ;;  %vm91_vm0 = vcmask 261120  }
  0x14   :  { %v3072_v1 = vld [vmem:[#allocation3] sm:$0xff]  ;;  %189 = vxpose.xlu1.b32.start [1/4] (short) (narrow) %v3070_v0, 32  ;;  %v3076_v3 = vld [vmem:[#allocation3 + $0x8] sm:$0xff]  ;;  %v33_v4 = vld [vmem:[#allocation3 + $0x30] sm:$0xff]  ;;  %v2751_v5 = vpack.c.bf16 %v32_v2, %v3070_v0 }
  0x15   :  { %59 = vxpose.xlu0.b32.start [1/4] (short) (narrow) %v3072_v1, 32  ;;  %v3079_v6 = vld [vmem:[#allocation3 + $0x10] sm:$0xff]  ;;  %v34_v7 = vld [vmem:[#allocation3 + $0x38] sm:$0xff]  ;;  %v2743_v9 = vpack.c.bf16 %v3076_v3, %v3072_v1  ;;  %v39_v12 = vld [vmem:[#allocation3 + $0x60] sm:$0xff] }
  0x16   :  { %v30_v8 = vld [vmem:[#allocation3 + $0x18] sm:$0xff]  ;;  %2752 = vmatprep.subr.bf16.mxu1 %v2751_v5  ;;  %v2755_v11 = vpack.c.bf16 %v34_v7, %v33_v4  ;;  %v3086_v13 = vld [vmem:[#allocation3 + $0x40] sm:$0xff]  ;;  %v40_v14 = vld [vmem:[#allocation3 + $0x68] sm:$0xff] }
  0x17   :  { %v2747_v10 = vpack.c.bf16 %v30_v8, %v3079_v6  ;;  %2744 = vmatprep.subr.bf16.mxu0 %v2743_v9  ;;  %2754 = vmatpush3.bf16.msra.mxu1 %v2751_v5  ;;  %v36_v15 = vld [vmem:[#allocation3 + $0x48] sm:$0xff]  ;;  %v2767_v17 = vpack.c.bf16 %v40_v14, %v39_v12  ;;  %v41_v18 = vld [vmem:[#allocation3 + $0x70] sm:$0xff]  ;;  %v42_v20 = vld [vmem:[#allocation3 + $0x78] sm:$0xff] }
  0x18   :  { %190 = vxpose.xlu1.b32.cont [2/4] (short) (narrow) %v32_v2, 32  ;;  %2746 = vmatpush3.bf16.msra.mxu0 %v2743_v9  ;;  %v2759_v16 = vpack.c.bf16 %v36_v15, %v3086_v13  ;;  %v37_v19 = vld [vmem:[#allocation3 + $0x50] sm:$0xff]  ;;  %v38_v21 = vld [vmem:[#allocation3 + $0x58] sm:$0xff]  ;;  %v47_v22 = vld [vmem:[#allocation3 + $0xa0] sm:$0xff]  ;;  %v2771_v41 = vpack.c.bf16 %v42_v20, %v41_v18 }
  0x19   :  { %60 = vxpose.xlu0.b32.cont [2/4] (short) (narrow) %v3076_v3, 32  ;;  %2756 = vmatprep.subr.bf16.mxu1 %v2755_v11  ;;  %v43_v23 = vld [vmem:[#allocation3 + $0x80] sm:$0xff]  ;;  %v48_v24 = vld [vmem:[#allocation3 + $0xa8] sm:$0xff]  ;;  %v49_v26 = vld [vmem:[#allocation3 + $0xb0] sm:$0xff]  ;;  %v2763_v40 = vpack.c.bf16 %v38_v21, %v37_v19 }
  0x1a   :  { %2748 = vmatprep.subr.bf16.mxu0 %v2747_v10  ;;  %v44_v25 = vld [vmem:[#allocation3 + $0x88] sm:$0xff]  ;;  %v45_v27 = vld [vmem:[#allocation3 + $0x90] sm:$0xff]  ;;  %v50_v28 = vld [vmem:[#allocation3 + $0xb8] sm:$0xff]  ;;  %v2783_v45 = vpack.c.bf16 %v48_v24, %v47_v22 }
  0x1b   :  { %2758 = vmatpush3.bf16.msra.mxu1 %v2755_v11  ;;  %v46_v29 = vld [vmem:[#allocation3 + $0x98] sm:$0xff]  ;;  %v55_v30 = vld [vmem:[#allocation3 + $0xe0] sm:$0xff]  ;;  %v56_v32 = vld [vmem:[#allocation3 + $0xe8] sm:$0xff]  ;;  %v2775_v44 = vpack.c.bf16 %v44_v25, %v43_v23  ;;  %v2787_v53 = vpack.c.bf16 %v50_v28, %v49_v26 }
  0x1c   :  { %191 = vxpose.xlu1.b32.cont [3/4] (short) (narrow) %v33_v4, 32  ;;  %2750 = vmatpush3.bf16.msra.mxu0 %v2747_v10  ;;  %v51_v31 = vld [vmem:[#allocation3 + $0xc0] sm:$0xff]  ;;  %v52_v33 = vld [vmem:[#allocation3 + $0xc8] sm:$0xff]  ;;  %v3090_v34 = vld [vmem:[#allocation3 + $0xf0] sm:$0xff]  ;;  %v2779_v52 = vpack.c.bf16 %v46_v29, %v45_v27  ;;  %v2799_v57 = vpack.c.bf16 %v56_v32, %v55_v30 }
  0x1d   :  { %61 = vxpose.xlu0.b32.cont [3/4] (short) (narrow) %v3079_v6, 32  ;;  %2760 = vmatprep.subr.bf16.mxu0 %v2759_v16  ;;  %v3092_v35 = vld [vmem:[#allocation3 + $0xd0] sm:$0xff]  ;;  %v3096_v36 = vld [vmem:[#allocation3 + $0xf8] sm:$0xff]  ;;  %v2791_v56 = vpack.c.bf16 %v52_v33, %v51_v31 }
  0x1e   :  { %2768 = vmatprep.subr.bf16.mxu1 %v2767_v17  ;;  %v3098_v37 = vld [vmem:[#allocation3 + $0xd8] sm:$0xff]  ;;  %v2803_v4 = vpack.c.bf16 %v3096_v36, %v3090_v34 }
  0x1f   :  { %v2795_v2 = vpack.c.bf16 %v3098_v37, %v3092_v35 }
  0x20   :  { %192 = vxpose.xlu1.b32.end [4/4] (short) (narrow) %v34_v7, 32 }
  0x21   :  { %62 = vxpose.xlu0.b32.end [4/4] (short) (narrow) %v30_v8, 32 }
  0x24   :  { %447 = vxpose.xlu1.b32.start [1/4] (short) (narrow) %v39_v12, 32 }
  0x25   :  { %318 = vxpose.xlu0.b32.start [1/4] (short) (narrow) %v3086_v13, 32 }
  0x28   :  { %448 = vxpose.xlu1.b32.cont [2/4] (short) (narrow) %v40_v14, 32 }
  0x29   :  { %319 = vxpose.xlu0.b32.cont [2/4] (short) (narrow) %v36_v15, 32 }
  0x2c   :  { %449 = vxpose.xlu1.b32.cont [3/4] (short) (narrow) %v41_v18, 32 }
  0x2d   :  { %320 = vxpose.xlu0.b32.cont [3/4] (short) (narrow) %v37_v19, 32 }
  0x30   :  { %450 = vxpose.xlu1.b32.end [4/4] (short) (narrow) %v42_v20, 32 }
  0x31   :  { %321 = vxpose.xlu0.b32.end [4/4] (short) (narrow) %v38_v21, 32 }
  0x34   :  { %705 = vxpose.xlu1.b32.start [1/4] (short) (narrow) %v47_v22, 32 }
  0x35   :  { %576 = vxpose.xlu0.b32.start [1/4] (short) (narrow) %v43_v23, 32 }
  0x38   :  { %706 = vxpose.xlu1.b32.cont [2/4] (short) (narrow) %v48_v24, 32 }
  0x39   :  { %577 = vxpose.xlu0.b32.cont [2/4] (short) (narrow) %v44_v25, 32 }
  0x3c   :  { %707 = vxpose.xlu1.b32.cont [3/4] (short) (narrow) %v49_v26, 32 }
  0x3d   :  { %578 = vxpose.xlu0.b32.cont [3/4] (short) (narrow) %v45_v27, 32 }
  0x40   :  { %708 = vxpose.xlu1.b32.end [4/4] (short) (narrow) %v50_v28, 32 }
  0x41   :  { %579 = vxpose.xlu0.b32.end [4/4] (short) (narrow) %v46_v29, 32 }
  0x44   :  { %963 = vxpose.xlu1.b32.start [1/4] (short) (narrow) %v55_v30, 32 }
  0x45   :  { %834 = vxpose.xlu0.b32.start [1/4] (short) (narrow) %v51_v31, 32 }
  0x48   :  { %964 = vxpose.xlu1.b32.cont [2/4] (short) (narrow) %v56_v32, 32 }
  0x49   :  { %835 = vxpose.xlu0.b32.cont [2/4] (short) (narrow) %v52_v33, 32 }
  0x4c   :  { %965 = vxpose.xlu1.b32.cont [3/4] (short) (narrow) %v3090_v34, 32 }
  0x4d   :  { %836 = vxpose.xlu0.b32.cont [3/4] (short) (narrow) %v3092_v35, 32 }
  0x50   :  { %966 = vxpose.xlu1.b32.end [4/4] (short) (narrow) %v3096_v36, 32 }
  0x51   :  { %837 = vxpose.xlu0.b32.end [4/4] (short) (narrow) %v3098_v37, 32 }
  0x94   :  { %v205_v38 = vpop.trf.xlu1 }
  0x95   :  { %v75_v39 = vpop.trf.xlu0  ;;  %2541 = vmatprep.mubr.msk.f32.mxu1 %vm91_vm0, %v205_v38 }
  0x96   :  { %2527 = vmatprep.mubr.msk.f32.mxu0 %vm91_vm0, %v75_v39 }
  0x98   :  { %v206_v42 = vpop.trf.xlu1 }
  0x99   :  { %v76_v43 = vpop.trf.xlu0  ;;  %2542 = vmatmul.mubr.msk.f32.vlgmr.msra.gmra.mrb[0].mxu1 %vm91_vm0, %v206_v42 }
  0x9a   :  { %2528 = vmatmul.mubr.msk.f32.vlgmr.msra.gmra.mrb[0].mxu0 %vm91_vm0, %v76_v43  ;;  %2770 = vmatpush3.bf16.msra.mxu1 %v2767_v17 }
  0x9b   :  { %2762 = vmatpush3.bf16.msra.mxu0 %v2759_v16  ;;  %2772 = vmatprep.subr.bf16.mxu1 %v2771_v41 }
  0x9c   :  { %2764 = vmatprep.subr.bf16.mxu0 %v2763_v40  ;;  %v207_v46 = vpop.trf.xlu1 }
  0x9d   :  { %v77_v47 = vpop.trf.xlu0  ;;  %2544 = vmatprep.mubr.msk.f32.mxu1 %vm91_vm0, %v207_v46 }
  0x9e   :  { %2530 = vmatprep.mubr.msk.f32.mxu0 %vm91_vm0, %v77_v47  ;;  %2774 = vmatpush3.bf16.msra.mxu1 %v2771_v41 }
  0x9f   :  { %2766 = vmatpush3.bf16.msra.mxu0 %v2763_v40  ;;  %2784 = vmatprep.subr.bf16.mxu1 %v2783_v45 }
  0xa0   :  { %2776 = vmatprep.subr.bf16.mxu0 %v2775_v44  ;;  %v208_v48 = vpop.trf.xlu1 }
  0xa1   :  { %v78_v49 = vpop.trf.xlu0  ;;  %2545 = vmatmul.mubr.msk.f32.gmra.mrb[2].mxu1 %vm91_vm0, %v208_v48 }
  0xa2   :  { %2531 = vmatmul.mubr.msk.f32.gmra.mrb[2].mxu0 %vm91_vm0, %v78_v49 }
  0xa4   :  { %v463_v50 = vpop.trf.xlu1 }
  0xa5   :  { %v334_v51 = vpop.trf.xlu0  ;;  %2569 = vmatprep.mubr.msk.f32.mxu1 %vm91_vm0, %v463_v50 }
  0xa6   :  { %2555 = vmatprep.mubr.msk.f32.mxu0 %vm91_vm0, %v334_v51 }
  0xa8   :  { %v464_v54 = vpop.trf.xlu1 }
  0xa9   :  { %v335_v55 = vpop.trf.xlu0  ;;  %2570 = vmatmul.mubr.msk.f32.vlgmr.msra.gmra.mrb[4].mxu1 %vm91_vm0, %v464_v54 }
  0xaa   :  { %2556 = vmatmul.mubr.msk.f32.vlgmr.msra.gmra.mrb[4].mxu0 %vm91_vm0, %v335_v55  ;;  %2786 = vmatpush3.bf16.msra.mxu1 %v2783_v45 }
  0xab   :  { %2778 = vmatpush3.bf16.msra.mxu0 %v2775_v44  ;;  %2788 = vmatprep.subr.bf16.mxu1 %v2787_v53 }
  0xac   :  { %2780 = vmatprep.subr.bf16.mxu0 %v2779_v52  ;;  %v465_v58 = vpop.trf.xlu1 }
  0xad   :  { %v336_v59 = vpop.trf.xlu0  ;;  %2572 = vmatprep.mubr.msk.f32.mxu1 %vm91_vm0, %v465_v58 }
  0xae   :  { %2558 = vmatprep.mubr.msk.f32.mxu0 %vm91_vm0, %v336_v59  ;;  %2790 = vmatpush3.bf16.msra.mxu1 %v2787_v53 }
  0xaf   :  { %2782 = vmatpush3.bf16.msra.mxu0 %v2779_v52  ;;  %2800 = vmatprep.subr.bf16.mxu1 %v2799_v57 }
  0xb0   :  { %2792 = vmatprep.subr.bf16.mxu0 %v2791_v56  ;;  %v466_v60 = vpop.trf.xlu1 }
  0xb1   :  { %v337_v61 = vpop.trf.xlu0  ;;  %2573 = vmatmul.mubr.msk.f32.gmra.mrb[6].mxu1 %vm91_vm0, %v466_v60 }
  0xb2   :  { %2559 = vmatmul.mubr.msk.f32.gmra.mrb[6].mxu0 %vm91_vm0, %v337_v61 }
  0xb4   :  { %v721_v62 = vpop.trf.xlu1 }
  0xb5   :  { %v592_v63 = vpop.trf.xlu0  ;;  %2597 = vmatprep.mubr.msk.f32.mxu1 %vm91_vm0, %v721_v62 }
  0xb6   :  { %2583 = vmatprep.mubr.msk.f32.mxu0 %vm91_vm0, %v592_v63 }
  0xb8   :  { %v722_v5 = vpop.trf.xlu1 }
  0xb9   :  { %v593_v7 = vpop.trf.xlu0  ;;  %2598 = vmatmul.mubr.msk.f32.vlgmr.msra.gmra.mrb[8].mxu1 %vm91_vm0, %v722_v5 }
  0xba   :  { %2584 = vmatmul.mubr.msk.f32.vlgmr.msra.gmra.mrb[8].mxu0 %vm91_vm0, %v593_v7  ;;  %2802 = vmatpush3.bf16.msra.mxu1 %v2799_v57 }
  0xbb   :  { %2794 = vmatpush3.bf16.msra.mxu0 %v2791_v56  ;;  %2804 = vmatprep.subr.bf16.mxu1 %v2803_v4 }
  0xbc   :  { %2796 = vmatprep.subr.bf16.mxu0 %v2795_v2  ;;  %v723_v8 = vpop.trf.xlu1 }
  0xbd   :  { %v594_v9 = vpop.trf.xlu0  ;;  %2600 = vmatprep.mubr.msk.f32.mxu1 %vm91_vm0, %v723_v8 }
  0xbe   :  { %2586 = vmatprep.mubr.msk.f32.mxu0 %vm91_vm0, %v594_v9  ;;  %2806 = vmatpush3.bf16.msra.mxu1 %v2803_v4 }
  0xbf   :  { %2798 = vmatpush3.bf16.msra.mxu0 %v2795_v2 }
  0xc0   :  { %v724_v10 = vpop.trf.xlu1 }
  0xc1   :  { %v595_v11 = vpop.trf.xlu0  ;;  %2601 = vmatmul.mubr.msk.f32.gmra.mrb[10].mxu1 %vm91_vm0, %v724_v10 }
  0xc2   :  { %2587 = vmatmul.mubr.msk.f32.gmra.mrb[10].mxu0 %vm91_vm0, %v595_v11 }
  0xc4   :  { %v979_v12 = vpop.trf.xlu1 }
  0xc5   :  { %v850_v14 = vpop.trf.xlu0  ;;  %2625 = vmatprep.mubr.msk.f32.mxu1 %vm91_vm0, %v979_v12 }
  0xc6   :  { %2611 = vmatprep.mubr.msk.f32.mxu0 %vm91_vm0, %v850_v14 }
  0xc8   :  { %v980_v15 = vpop.trf.xlu1 }
  0xc9   :  { %v851_v16 = vpop.trf.xlu0  ;;  %2626 = vmatmul.mubr.msk.f32.vlgmr.msra.gmra.mrb[12].mxu1 %vm91_vm0, %v980_v15 }
  0xca   :  { %2612 = vmatmul.mubr.msk.f32.vlgmr.msra.gmra.mrb[12].mxu0 %vm91_vm0, %v851_v16 }
  0xcc   :  { %v981_v17 = vpop.trf.xlu1 }
  0xcd   :  { %v852_v18 = vpop.trf.xlu0  ;;  %2628 = vmatprep.mubr.msk.f32.mxu1 %vm91_vm0, %v981_v17 }
  0xce   :  { %2614 = vmatprep.mubr.msk.f32.mxu0 %vm91_vm0, %v852_v18 }
  0xd0   :  { %v982_v19 = vpop.trf.xlu1 }
  0xd1   :  { %v853_v20 = vpop.trf.xlu0  ;;  %2629 = vmatmul.mubr.msk.f32.gmra.mrb[14].mxu1 %vm91_vm0, %v982_v19 }
  0xd2   :  { %2615 = vmatmul.mubr.msk.f32.gmra.mrb[14].mxu0 %vm91_vm0, %v853_v20  ;;  %2653 = vmatprep.mubr.msk.f32.mxu1 %vm91_vm0, %v3070_v0 }
  0xd3   :  { %2639 = vmatprep.mubr.msk.f32.mxu0 %vm91_vm0, %v3072_v1 }
 0x16c   :  { %v3142_v22 = vpop.f32.mrb[0].mxu1 }
 0x16d   :  { %v2529_v21 = vpop.f32.mrb[0].mxu0  ;;  %v1106_v24 = vsel %vm91_vm0, %v3142_v22, -inf  ;;  %v299_v26 = vpop.f32.mrb[1].mxu1 }
 0x16e   :  { %v1093_v23 = vsel %vm91_vm0, %v2529_v21, -inf  ;;  %v170_v25 = vpop.f32.mrb[1].mxu0  ;;  %v1105_v28 = vsel %vm91_vm0, %v299_v26, -inf }
 0x16f   :  { %v1092_v27 = vsel %vm91_vm0, %v170_v25, -inf  ;;  %v1107_v30 = vmax.f32 %v1105_v28, %v1106_v24 }
 0x170   :  { %v1094_v29 = vmax.f32 %v1092_v27, %v1093_v23 }
 0x174   :  { %v2546_v31 = vpop.f32.mrb[2].mxu1 }
 0x175   :  { %v2532_v1 = vpop.f32.mrb[2].mxu0  ;;  %v309_v0 = vpop.f32.mrb[3].mxu1  ;;  %v1110_v38 = vsel %vm91_vm0, %v2546_v31, -inf }
 0x176   :  { %v180_v32 = vpop.f32.mrb[3].mxu0  ;;  %v1108_v34 = vsel %vm91_vm0, %v309_v0, -inf  ;;  %v1097_v37 = vsel %vm91_vm0, %v2532_v1, -inf }
 0x177   :  { %v1095_v33 = vsel %vm91_vm0, %v180_v32, -inf  ;;  %v1109_v36 = vmax.f32 %v1107_v30, %v1108_v34 }
 0x178   :  { %v1096_v35 = vmax.f32 %v1094_v29, %v1095_v33 }
 0x179   :  { %v1111_v40 = vmax.f32 %v1109_v36, %v1110_v38 }
 0x17a   :  { %v1098_v39 = vmax.f32 %v1096_v35, %v1097_v37 }
 0x17b   :  { %v1112_v42 = vrot.slane %v1111_v40, 4 }
 0x17c   :  { %v1099_v41 = vrot.slane %v1098_v39, 4  ;;  %v3155_v44 = vpop.f32.mrb[4].mxu1 }
 0x17d   :  { %v3153_v43 = vpop.f32.mrb[4].mxu0  ;;  %v1113_v46 = vmax.f32 %v1111_v40, %v1112_v42  ;;  %v1132_v48 = vsel %vm91_vm0, %v3155_v44, -inf  ;;  %v3163_v50 = vpop.f32.mrb[5].mxu1 }
 0x17e   :  { %v1100_v45 = vmax.f32 %v1098_v39, %v1099_v41  ;;  %v1119_v47 = vsel %vm91_vm0, %v3153_v43, -inf  ;;  %v3161_v49 = vpop.f32.mrb[5].mxu0  ;;  %v1131_v52 = vsel %vm91_vm0, %v3163_v50, -inf }
 0x17f   :  { %v1118_v51 = vsel %vm91_vm0, %v3161_v49, -inf  ;;  %v1114_v54 = vrot.slane %v1113_v46, 2  ;;  %v1133_v56 = vmax.f32 %v1131_v52, %v1132_v48 }
 0x180   :  { %v1101_v53 = vrot.slane %v1100_v45, 2  ;;  %v1120_v55 = vmax.f32 %v1118_v51, %v1119_v47 }
 0x181   :  { %v1115_v58 = vmax.f32 %v1113_v46, %v1114_v54 }
 0x182   :  { %v1102_v57 = vmax.f32 %v1100_v45, %v1101_v53 }
 0x183   :  { %v1116_v60 = vrot.slane %v1115_v58, 1 }
 0x184   :  { %v1103_v59 = vrot.slane %v1102_v57, 1  ;;  %v3171_v62 = vpop.f32.mrb[6].mxu1 }
 0x185   :  { %v3169_v61 = vpop.f32.mrb[6].mxu0  ;;  %v1117_v2 = vmax.f32 %v1115_v58, %v1116_v60  ;;  %v3175_v5 = vpop.f32.mrb[7].mxu1  ;;  %v1136_v28 = vsel %vm91_vm0, %v3171_v62, -inf }
 0x186   :  { %v1104_v63 = vmax.f32 %v1102_v57, %v1103_v59  ;;  %v3173_v4 = vpop.f32.mrb[7].mxu0  ;;  %v1134_v8 = vsel %vm91_vm0, %v3175_v5, -inf  ;;  %v1123_v27 = vsel %vm91_vm0, %v3169_v61, -inf }
 0x187   :  { %v1121_v7 = vsel %vm91_vm0, %v3173_v4, -inf  ;;  %v1200_v14 = vsub.f32 %v299_v26, %v1117_v2  ;;  %v1201_v15 = vsub.f32 %v3142_v22, %v1117_v2  ;;  %v1202_v16 = vsub.f32 %v309_v0, %v1117_v2 }
 0x188   :  { %v1196_v9 = vsub.f32 %v170_v25, %v1104_v63  ;;  %v1197_v10 = vsub.f32 %v2529_v21, %v1104_v63  ;;  %v1198_v11 = vsub.f32 %v180_v32, %v1104_v63  ;;  %v1199_v12 = vsub.f32 %v2532_v1, %v1104_v63 }
 0x189   :  { %v1203_v17 = vsub.f32 %v2546_v31, %v1117_v2  ;;  %v1122_v23 = vmax.f32 %v1120_v55, %v1121_v7  ;;  %v1135_v25 = vmax.f32 %v1133_v56, %v1134_v8  ;;  %v1236_v21 = vmul.f32 1.442695, %v1200_v14 }
 0x18a   :  { %v1228_v18 = vmul.f32 1.442695, %v1196_v9  ;;  %v1230_v19 = vmul.f32 1.442695, %v1197_v10  ;;  %v1232_v20 = vmul.f32 1.442695, %v1198_v11 }
 0x18b   :  { %v1234_v24 = vmul.f32 1.442695, %v1199_v12  ;;  %v1238_v29 = vmul.f32 1.442695, %v1201_v15  ;;  %v1124_v26 = vmax.f32 %v1122_v23, %v1123_v27  ;;  %v1240_v22 = vmul.f32 1.442695, %v1202_v16 }
 0x18c   :  { %2876 = vpow2.f32 %v1228_v18  ;;  %v1242_v30 = vmul.f32 1.442695, %v1203_v17  ;;  %v1137_v1 = vmax.f32 %v1135_v25, %v1136_v28  ;;  %v3188_v32 = vpop.f32.mrb[8].mxu1 }
 0x18d   :  { %2878 = vpow2.f32 %v1230_v19  ;;  %v3186_v31 = vpop.f32.mrb[8].mxu0  ;;  %v1125_v0 = vrot.slane %v1124_v26, 4  ;;  %v1158_v34 = vsel %vm91_vm0, %v3188_v32, -inf  ;;  %v3196_v36 = vpop.f32.mrb[9].mxu1 }
 0x18e   :  { %2880 = vpow2.f32 %v1232_v20  ;;  %v1145_v33 = vsel %vm91_vm0, %v3186_v31, -inf  ;;  %v3194_v35 = vpop.f32.mrb[9].mxu0  ;;  %v1138_v37 = vrot.slane %v1137_v1, 4  ;;  %v1157_v39 = vsel %vm91_vm0, %v3196_v36, -inf }
 0x18f   :  { %2882 = vpow2.f32 %v1234_v24  ;;  %v1144_v38 = vsel %vm91_vm0, %v3194_v35, -inf  ;;  %v1126_v40 = vmax.f32 %v1124_v26, %v1125_v0  ;;  %v1159_v42 = vmax.f32 %v1157_v39, %v1158_v34 }
 0x190   :  { %2884 = vpow2.f32 %v1236_v21  ;;  %v1146_v41 = vmax.f32 %v1144_v38, %v1145_v33  ;;  %v1139_v45 = vmax.f32 %v1137_v1, %v1138_v37 }
 0x191   :  { %2886 = vpow2.f32 %v1238_v29  ;;  %v1127_v46 = vrot.slane %v1126_v40, 2 }
 0x192   :  { %2888 = vpow2.f32 %v1240_v22  ;;  %v1140_v47 = vrot.slane %v1139_v45, 2 }
 0x193   :  { %2890 = vpow2.f32 %v1242_v30  ;;  %v1128_v48 = vmax.f32 %v1126_v40, %v1127_v46 }
 0x194   :  { %v1141_v51 = vmax.f32 %v1139_v45, %v1140_v47  ;;  %v3204_v53 = vpop.f32.mrb[10].mxu1 }
 0x195   :  { %v3202_v52 = vpop.f32.mrb[10].mxu0  ;;  %v1129_v55 = vrot.slane %v1128_v48, 1  ;;  %v3212_v58 = vpop.f32.mrb[11].mxu1  ;;  %v1162_v18 = vsel %vm91_vm0, %v3204_v53, -inf }
 0x196   :  { %v3206_v54 = vpop.eup %2876  ;;  %v1149_v56 = vsel %vm91_vm0, %v3202_v52, -inf  ;;  %v3210_v57 = vpop.f32.mrb[11].mxu0  ;;  %v1142_v63 = vrot.slane %v1141_v51, 1  ;;  %v1160_v7 = vsel %vm91_vm0, %v3212_v58, -inf }
 0x197   :  { %v3214_v59 = vpop.eup %2878  ;;  %v1292_v60 = vsel %vm91_vm0, %v3206_v54, 0.0  ;;  %v1147_v2 = vsel %vm91_vm0, %v3210_v57, -inf  ;;  %v1130_v10 = vmax.f32 %v1128_v48, %v1129_v55  ;;  %v1161_v12 = vmax.f32 %v1159_v42, %v1160_v7 }
 0x198   :  { %v3222_v8 = vpop.eup %2880  ;;  %v1293_v9 = vsel %vm91_vm0, %v3214_v59, 0.0  ;;  %v1148_v11 = vmax.f32 %v1146_v41, %v1147_v2  ;;  %v1143_v17 = vmax.f32 %v1141_v51, %v1142_v63 }
 0x199   :  { %v3226_v14 = vpop.eup %2882  ;;  %v1294_v15 = vadd.f32 %v1293_v9, %v1292_v60  ;;  %v1295_v16 = vsel %vm91_vm0, %v3222_v8, 0.0  ;;  %v1204_v23 = vsub.f32 %v3161_v49, %v1130_v10  ;;  %v1205_v24 = vsub.f32 %v3153_v43, %v1130_v10 }
 0x19a   :  { %v3232_v19 = vpop.eup %2884  ;;  %v1297_v20 = vsel %vm91_vm0, %v3226_v14, 0.0  ;;  %v1206_v27 = vsub.f32 %v3173_v4, %v1130_v10  ;;  %v1207_v29 = vsub.f32 %v3169_v61, %v1130_v10  ;;  %v1208_v26 = vsub.f32 %v3163_v50, %v1143_v17 }
 0x19b   :  { %v3239_v28 = vpop.eup %2886  ;;  %v1296_v25 = vadd.f32 %v1295_v16, %v1294_v15  ;;  %v1305_v21 = vsel %vm91_vm0, %v3232_v19, 0.0  ;;  %v1244_v49 = vmul.f32 1.442695, %v1204_v23  ;;  %v1246_v1 = vmul.f32 1.442695, %v1205_v24 }
 0x19c   :  { %v3245_v22 = vpop.eup %2888  ;;  %v1306_v30 = vsel %vm91_vm0, %v3239_v28, 0.0  ;;  %v1209_v43 = vsub.f32 %v3155_v44, %v1143_v17  ;;  %v1248_v37 = vmul.f32 1.442695, %v1206_v27  ;;  %v3256_v50 = vpop.f32.mrb[12].mxu1  ;;  %v1250_v39 = vmul.f32 1.442695, %v1207_v29 }
 0x19d   :  { %v3250_v4 = vpop.eup %2890  ;;  %v1298_v0 = vadd.f32 %v1297_v20, %v1296_v25  ;;  %v1307_v33 = vadd.f32 %v1306_v30, %v1305_v21  ;;  %v1308_v34 = vsel %vm91_vm0, %v3245_v22, 0.0  ;;  %v3254_v61 = vpop.f32.mrb[12].mxu0  ;;  %2892 = vpow2.f32 %v1244_v49 }
 0x19e   :  { %v1310_v38 = vsel %vm91_vm0, %v3250_v4, 0.0  ;;  %v1210_v40 = vsub.f32 %v3175_v5, %v1143_v17  ;;  %v3261_v44 = vpop.f32.mrb[13].mxu0  ;;  %v3263_v41 = vpop.f32.mrb[13].mxu1  ;;  %2894 = vpow2.f32 %v1246_v1  ;;  %v1211_v46 = vsub.f32 %v3171_v62, %v1143_v17 }
 0x19f   :  { %v1299_v42 = vrot.slane %v1298_v0, 4  ;;  %v1309_v45 = vadd.f32 %v1308_v34, %v1307_v33  ;;  %2896 = vpow2.f32 %v1248_v37  ;;  %v1252_v47 = vmul.f32 1.442695, %v1208_v26 }
 0x1a0   :  { %v1254_v48 = vmul.f32 1.442695, %v1209_v43  ;;  %v1256_v51 = vmul.f32 1.442695, %v1210_v40  ;;  %2898 = vpow2.f32 %v1250_v39  ;;  %v1258_v63 = vmul.f32 1.442695, %v1211_v46 }
 0x1a1   :  { %v1300_v55 = vadd.f32 %v1299_v42, %v1298_v0  ;;  %v1311_v60 = vadd.f32 %v1310_v38, %v1309_v45  ;;  %2900 = vpow2.f32 %v1252_v47  ;;  %v1150_v2 = vmax.f32 %v1148_v11, %v1149_v56 }
 0x1a2   :  { %v1163_v5 = vmax.f32 %v1161_v12, %v1162_v18  ;;  %v1171_v7 = vsel %vm91_vm0, %v3254_v61, -inf  ;;  %2902 = vpow2.f32 %v1254_v48  ;;  %v1184_v62 = vsel %vm91_vm0, %v3256_v50, -inf }
 0x1a3   :  { %v1301_v9 = vrot.slane %v1300_v55, 2  ;;  %v1312_v10 = vrot.slane %v1311_v60, 4  ;;  %2904 = vpow2.f32 %v1256_v51  ;;  %v1151_v15 = vrot.slane %v1150_v2, 4 }
 0x1a4   :  { %v1164_v16 = vrot.slane %v1163_v5, 4  ;;  %v1170_v17 = vsel %vm91_vm0, %v3261_v44, -inf  ;;  %2906 = vpow2.f32 %v1258_v63  ;;  %v3274_v12 = vpop.f32.mrb[14].mxu1  ;;  %v1183_v27 = vsel %vm91_vm0, %v3263_v41, -inf }
 0x1a5   :  { %v1302_v20 = vadd.f32 %v1301_v9, %v1300_v55  ;;  %v1313_v23 = vadd.f32 %v1312_v10, %v1311_v60  ;;  %v1172_v56 = vmax.f32 %v1170_v17, %v1171_v7  ;;  %v3272_v11 = vpop.f32.mrb[14].mxu0  ;;  %v1152_v18 = vmax.f32 %v1150_v2, %v1151_v15  ;;  %v3282_v29 = vpop.f32.mrb[15].mxu1 }
 0x1a6   :  { %v1165_v24 = vmax.f32 %v1163_v5, %v1164_v16  ;;  %v1175_v25 = vsel %vm91_vm0, %v3272_v11, -inf  ;;  %v3280_v21 = vpop.f32.mrb[15].mxu0  ;;  %v1185_v49 = vmax.f32 %v1183_v27, %v1184_v62  ;;  %v1188_v1 = vsel %vm91_vm0, %v3274_v12, -inf }
 0x1a7   :  { %v1303_v26 = vrot.slane %v1302_v20, 1  ;;  %v1314_v30 = vrot.slane %v1313_v23, 2  ;;  %v3286_v43 = vpop.eup %2892  ;;  %v1153_v0 = vrot.slane %v1152_v18, 2  ;;  %v1173_v34 = vsel %vm91_vm0, %v3280_v21, -inf }
 0x1a8   :  { %v1166_v33 = vrot.slane %v1165_v24, 2  ;;  %v1186_v37 = vsel %vm91_vm0, %v3282_v29, -inf  ;;  %v3292_v38 = vpop.eup %2894  ;;  %v1318_v42 = vsel %vm91_vm0, %v3286_v43, 0.0  ;;  %v1174_v45 = vmax.f32 %v1172_v56, %v1173_v34 }
 0x1a9   :  { %v1304_v39 = vadd.f32 %v1303_v26, %v1302_v20  ;;  %v1315_v40 = vadd.f32 %v1314_v30, %v1313_v23  ;;  %v3296_v46 = vpop.eup %2896  ;;  %v1319_v47 = vsel %vm91_vm0, %v3292_v38, 0.0  ;;  %v1154_v48 = vmax.f32 %v1152_v18, %v1153_v0 }
 0x1aa   :  { %v1167_v51 = vmax.f32 %v1165_v24, %v1166_v33  ;;  %v1187_v55 = vmax.f32 %v1185_v49, %v1186_v37  ;;  %v3300_v60 = vpop.eup %2898  ;;  %v1320_v2 = vadd.f32 %v1319_v47, %v1318_v42  ;;  %v1321_v5 = vsel %vm91_vm0, %v3296_v46, 0.0 }
 0x1ab   :  { %2908 = vrcp.f32 %v1304_v39  ;;  %v1316_v63 = vrot.slane %v1315_v40, 1  ;;  %v3304_v7 = vpop.eup %2900  ;;  %v1323_v9 = vsel %vm91_vm0, %v3300_v60, 0.0  ;;  %v1155_v10 = vrot.slane %v1154_v48, 1 }
 0x1ac   :  { %v1168_v62 = vrot.slane %v1167_v51, 1  ;;  %v1176_v15 = vmax.f32 %v1174_v45, %v1175_v25  ;;  %v3308_v16 = vpop.eup %2902  ;;  %v1322_v20 = vadd.f32 %v1321_v5, %v1320_v2  ;;  %v1331_v23 = vsel %vm91_vm0, %v3304_v7, 0.0 }
 0x1ad   :  { %v1317_v17 = vadd.f32 %v1316_v63, %v1315_v40  ;;  %v1189_v56 = vmax.f32 %v1187_v55, %v1188_v1  ;;  %v3312_v18 = vpop.eup %2904  ;;  %v1332_v24 = vsel %vm91_vm0, %v3308_v16, 0.0  ;;  %v1156_v27 = vmax.f32 %v1154_v48, %v1155_v10 }
 0x1ae   :  { %v1169_v26 = vmax.f32 %v1167_v51, %v1168_v62  ;;  %v1177_v30 = vrot.slane %v1176_v15, 4  ;;  %v3316_v49 = vpop.eup %2906  ;;  %v1324_v25 = vadd.f32 %v1323_v9, %v1322_v20  ;;  %v1333_v0 = vadd.f32 %v1332_v24, %v1331_v23 }
 0x1af   :  { %2910 = vrcp.f32 %v1317_v17  ;;  %v1334_v33 = vsel %vm91_vm0, %v3312_v18, 0.0  ;;  %v1336_v34 = vsel %vm91_vm0, %v3316_v49, 0.0  ;;  %v1212_v1 = vsub.f32 %v3194_v35, %v1156_v27 }
 0x1b0   :  { %v1213_v37 = vsub.f32 %v3186_v31, %v1156_v27  ;;  %v1214_v39 = vsub.f32 %v3210_v57, %v1156_v27  ;;  %v1325_v40 = vrot.slane %v1324_v25, 4  ;;  %v1335_v42 = vadd.f32 %v1334_v33, %v1333_v0 }
 0x1b1   :  { %v1215_v45 = vsub.f32 %v3202_v52, %v1156_v27  ;;  %v1216_v47 = vsub.f32 %v3196_v36, %v1169_v26  ;;  %v1260_v48 = vmul.f32 1.442695, %v1212_v1  ;;  %v1217_v63 = vsub.f32 %v3188_v32, %v1169_v26 }
 0x1b2   :  { %v1262_v51 = vmul.f32 1.442695, %v1213_v37  ;;  %v1264_v55 = vmul.f32 1.442695, %v1214_v39  ;;  %v1326_v2 = vadd.f32 %v1325_v40, %v1324_v25  ;;  %v1337_v5 = vadd.f32 %v1336_v34, %v1335_v42 }
 0x1b3   :  { %v1266_v9 = vmul.f32 1.442695, %v1215_v45  ;;  %v1218_v35 = vsub.f32 %v3212_v58, %v1169_v26  ;;  %2912 = vpow2.f32 %v1260_v48  ;;  %v1219_v31 = vsub.f32 %v3204_v53, %v1169_v26 }
 0x1b4   :  { %v1268_v57 = vmul.f32 1.442695, %v1216_v47  ;;  %v1270_v10 = vmul.f32 1.442695, %v1217_v63  ;;  %v1327_v17 = vrot.slane %v1326_v2, 2  ;;  %v1338_v52 = vrot.slane %v1337_v5, 4 }
 0x1b5   :  { %v2909_v62 = vpop.eup %2908  ;;  %2914 = vpow2.f32 %v1262_v51  ;;  %v1272_v36 = vmul.f32 1.442695, %v1218_v35  ;;  %v1274_v20 = vmul.f32 1.442695, %v1219_v31  ;;  %v1178_v23 = vmax.f32 %v1176_v15, %v1177_v30 }
 0x1b6   :  { %2916 = vpow2.f32 %v1264_v55  ;;  %v1190_v24 = vrot.slane %v1189_v56, 4  ;;  %v1328_v32 = vadd.f32 %v1327_v17, %v1326_v2  ;;  %v1339_v27 = vadd.f32 %v1338_v52, %v1337_v5 }
 0x1b7   :  { %2918 = vpow2.f32 %v1266_v9  ;;  %v1404_v25 = vmul.f32 %v2909_v62, %v3206_v54  ;;  %v1179_v58 = vrot.slane %v1178_v23, 2  ;;  %v1405_v53 = vmul.f32 %v2909_v62, %v3214_v59 }
 0x1b8   :  { %2920 = vpow2.f32 %v1268_v57  ;;  %v1191_v0 = vmax.f32 %v1189_v56, %v1190_v24  ;;  %v1329_v33 = vrot.slane %v1328_v32, 1  ;;  %v1340_v34 = vrot.slane %v1339_v27, 2 }
 0x1b9   :  { %v2911_v26 = vpop.eup %2910  ;;  %2922 = vpow2.f32 %v1270_v10  ;;  %v1406_v1 = vmul.f32 %v2909_v62, %v3222_v8  ;;  %v1180_v37 = vmax.f32 %v1178_v23, %v1179_v58  ;;  %v2807_v30 = vpack.c.bf16 %v1405_v53, %v1404_v25 }
 0x1ba   :  { %2924 = vpow2.f32 %v1272_v36  ;;  %v1192_v15 = vrot.slane %v1191_v0, 2  ;;  %v1330_v39 = vadd.f32 %v1329_v33, %v1328_v32  ;;  %v1341_v40 = vadd.f32 %v1340_v34, %v1339_v27 }
 0x1bb   :  { %2926 = vpow2.f32 %v1274_v20  ;;  %v1408_v54 = vmul.f32 %v2911_v26, %v3232_v19  ;;  %v1181_v42 = vrot.slane %v1180_v37, 1  ;;  %2808 = vmatprep.subr.bf16.mxu0 %v2807_v30  ;;  %v1409_v59 = vmul.f32 %v2911_v26, %v3239_v28 }
 0x1bc   :  { %v1193_v45 = vmax.f32 %v1191_v0, %v1192_v15  ;;  %v1407_v56 = vmul.f32 %v2909_v62, %v3226_v14  ;;  %2928 = vrcp.f32 %v1330_v39  ;;  %v1342_v47 = vrot.slane %v1341_v40, 1  ;;  %2810 = vmatpush3.bf16.msra.mxu0 %v2807_v30 }
 0x1bd   :  { %v1410_v8 = vmul.f32 %v2911_v26, %v3245_v22  ;;  %v1411_v48 = vmul.f32 %v2911_v26, %v3250_v4  ;;  %v3338_v51 = vpop.eup %2912  ;;  %v1182_v55 = vmax.f32 %v1180_v37, %v1181_v42  ;;  %v2815_v2 = vpack.c.bf16 %v1409_v59, %v1408_v54  ;;  %v3383_v59 = vld [vmem:[#allocation3 + $0x28] sm:$0xff] }
 0x1be   :  { %v1194_v63 = vrot.slane %v1193_v45, 1  ;;  %v2811_v19 = vpack.c.bf16 %v1407_v56, %v1406_v1  ;;  %v1343_v9 = vadd.f32 %v1342_v47, %v1341_v40  ;;  %v1344_v28 = vsel %vm91_vm0, %v3338_v51, 0.0  ;;  %v3392_v47 = vld [vmem:[#allocation3 + $0x30] sm:$0xff] }
 0x1bf   :  { %v3340_v5 = vpop.eup %2914  ;;  %v2819_v14 = vpack.c.bf16 %v1411_v48, %v1410_v8  ;;  %v1220_v4 = vsub.f32 %v3261_v44, %v1182_v55  ;;  %v1221_v31 = vsub.f32 %v3254_v61, %v1182_v55  ;;  %v1222_v57 = vsub.f32 %v3280_v21, %v1182_v55  ;;  %2816 = vmatprep.subr.bf16.mxu1 %v2815_v2 }
 0x1c0   :  { %v3344_v35 = vpop.eup %2916  ;;  %v1345_v22 = vsel %vm91_vm0, %v3340_v5, 0.0  ;;  %2812 = vmatprep.subr.bf16.mxu0 %v2811_v19  ;;  %2930 = vrcp.f32 %v1343_v9  ;;  %v1223_v52 = vsub.f32 %v3272_v11, %v1182_v55  ;;  %2818 = vmatpush3.bf16.msra.mxu1 %v2815_v2  ;;  %v1195_v20 = vmax.f32 %v1193_v45, %v1194_v63 }
 0x1c1   :  { %v3351_v10 = vpop.eup %2918  ;;  %v1346_v62 = vadd.f32 %v1345_v22, %v1344_v28  ;;  %v1347_v17 = vsel %vm91_vm0, %v3344_v35, 0.0  ;;  %2814 = vmatpush3.bf16.msra.mxu0 %v2811_v19  ;;  %v1276_v44 = vmul.f32 1.442695, %v1220_v4  ;;  %v1278_v21 = vmul.f32 1.442695, %v1221_v31  ;;  %2820 = vmatprep.subr.bf16.mxu1 %v2819_v14  ;;  %v3402_v28 = vld [vmem:[#allocation3 + $0x38] sm:$0xff] }
 0x1c2   :  { %v3356_v36 = vpop.eup %2920  ;;  %v1349_v61 = vsel %vm91_vm0, %v3351_v10, 0.0  ;;  %v1280_v27 = vmul.f32 1.442695, %v1222_v57  ;;  %v1282_v25 = vmul.f32 1.442695, %v1223_v52  ;;  %v1224_v0 = vsub.f32 %v3263_v41, %v1195_v20 }
 0x1c3   :  { %v3360_v23 = vpop.eup %2922  ;;  %v1348_v24 = vadd.f32 %v1347_v17, %v1346_v62  ;;  %v1357_v32 = vsel %vm91_vm0, %v3356_v36, 0.0  ;;  %2932 = vpow2.f32 %v1276_v44  ;;  %v1225_v53 = vsub.f32 %v3256_v50, %v1195_v20 }
 0x1c4   :  { %v3364_v11 = vpop.eup %2924  ;;  %v1358_v58 = vsel %vm91_vm0, %v3360_v23, 0.0  ;;  %2640 = vmatmul.mubr.msk.f32.vlgmr.msra.gmra.mrb[16].mxu0 %vm91_vm0, %v3076_v3  ;;  %2934 = vpow2.f32 %v1278_v21  ;;  %2822 = vmatpush3.bf16.msra.mxu1 %v2819_v14  ;;  %v1226_v50 = vsub.f32 %v3282_v29, %v1195_v20  ;;  %v1227_v3 = vsub.f32 %v3274_v12, %v1195_v20 }
 0x1c5   :  { %v3372_v26 = vpop.eup %2926  ;;  %v1350_v33 = vadd.f32 %v1349_v61, %v1348_v24  ;;  %v1359_v34 = vadd.f32 %v1358_v58, %v1357_v32  ;;  %v1360_v1 = vsel %vm91_vm0, %v3364_v11, 0.0  ;;  %2642 = vmatprep.mubr.msk.f32.mxu0 %vm91_vm0, %v3079_v6  ;;  %2936 = vpow2.f32 %v1280_v27  ;;  %v3387_v6 = vld [vmem:[#allocation3 + $0x18] sm:$0xff] }
 0x1c6   :  { %v1362_v41 = vsel %vm91_vm0, %v3372_v26, 0.0  ;;  %v2929_v37 = vpop.eup %2928  ;;  %2938 = vpow2.f32 %v1282_v25  ;;  %v1284_v39 = vmul.f32 1.442695, %v1224_v0  ;;  %v1286_v40 = vmul.f32 1.442695, %v1225_v53 }
 0x1c7   :  { %v1351_v15 = vrot.slane %v1350_v33, 4  ;;  %v1361_v30 = vadd.f32 %v1360_v1, %v1359_v34  ;;  %v1288_v54 = vmul.f32 1.442695, %v1226_v50  ;;  %v1290_v42 = vmul.f32 1.442695, %v1227_v3  ;;  %2654 = vmatmul.mubr.msk.f32.vlgmr.msra.gmra.mrb[16].mxu1 %vm91_vm0, %v3383_v59 }
 0x1c8   :  { %v1412_v45 = vmul.f32 %v2929_v37, %v3286_v43  ;;  %2643 = vmatmul.mubr.msk.f32.gmra.mrb[18].mxu0 %vm91_vm0, %v3387_v6  ;;  %2940 = vpow2.f32 %v1284_v39  ;;  %v1413_v56 = vmul.f32 %v2929_v37, %v3292_v38  ;;  %2656 = vmatprep.mubr.msk.f32.mxu1 %vm91_vm0, %v3392_v47  ;;  %v1414_v43 = vmul.f32 %v2929_v37, %v3296_v46 }
 0x1c9   :  { %v1352_v12 = vadd.f32 %v1351_v15, %v1350_v33  ;;  %v1363_v29 = vadd.f32 %v1362_v41, %v1361_v30  ;;  %2667 = vmatprep.mubr.msk.f32.mxu0 %vm91_vm0, %v3086_v13  ;;  %2942 = vpow2.f32 %v1286_v40  ;;  %v1415_v8 = vmul.f32 %v2929_v37, %v3300_v60  ;;  %v3438_v41 = vld [vmem:[#allocation3 + $0x48] sm:$0xff]  ;;  %v3444_v37 = vld [vmem:[#allocation3 + $0x50] sm:$0xff] }
 0x1ca   :  { %v2931_v48 = vpop.eup %2930  ;;  %2944 = vpow2.f32 %v1288_v54  ;;  %v2823_v2 = vpack.c.bf16 %v1413_v56, %v1412_v45  ;;  %v3450_v40 = vld [vmem:[#allocation3 + $0x68] sm:$0xff]  ;;  %v3456_v45 = vld [vmem:[#allocation3 + $0x70] sm:$0xff]  ;;  %v3464_v56 = vld [vmem:[#allocation3 + $0x80] sm:$0xff] }
 0x1cb   :  { %v1353_v55 = vrot.slane %v1352_v12, 2  ;;  %v1364_v63 = vrot.slane %v1363_v29, 4  ;;  %2946 = vpow2.f32 %v1290_v42  ;;  %v1416_v38 = vmul.f32 %v2931_v48, %v3304_v7  ;;  %2657 = vmatmul.mubr.msk.f32.gmra.mrb[18].mxu1 %vm91_vm0, %v3402_v28  ;;  %v3410_v7 = vld [vmem:[#allocation3 + $0x60] sm:$0xff] }
 0x1cc   :  { %v1417_v19 = vmul.f32 %v2931_v48, %v3308_v16  ;;  %v2827_v9 = vpack.c.bf16 %v1415_v8, %v1414_v43  ;;  %2824 = vmatprep.subr.bf16.mxu0 %v2823_v2  ;;  %v1418_v60 = vmul.f32 %v2931_v48, %v3312_v18  ;;  %v1419_v14 = vmul.f32 %v2931_v48, %v3316_v49  ;;  %v3468_v48 = vld [vmem:[#allocation3 + $0x78] sm:$0xff] }
 0x1cd   :  { %v1354_v13 = vadd.f32 %v1353_v55, %v1352_v12  ;;  %v1365_v46 = vadd.f32 %v1364_v63, %v1363_v29  ;;  %v3408_v22 = vpop.eup %2932  ;;  %2826 = vmatpush3.bf16.msra.mxu0 %v2823_v2  ;;  %2681 = vmatprep.mubr.msk.f32.mxu1 %vm91_vm0, %v3410_v7  ;;  %v3460_v12 = vld [vmem:[#allocation3 + $0x58] sm:$0xff]  ;;  %v3472_v2 = vld [vmem:[#allocation3 + $0xa0] sm:$0xff] }
 0x1ce   :  { %v2831_v4 = vpack.c.bf16 %v1417_v19, %v1416_v38  ;;  %v3414_v16 = vpop.eup %2934  ;;  %v1370_v62 = vsel %vm91_vm0, %v3408_v22, 0.0  ;;  %2828 = vmatprep.subr.bf16.mxu0 %v2827_v9  ;;  %v2835_v18 = vpack.c.bf16 %v1419_v14, %v1418_v60 }
 0x1cf   :  { %v1355_v31 = vrot.slane %v1354_v13, 1  ;;  %v1366_v57 = vrot.slane %v1365_v46, 2  ;;  %v3418_v17 = vpop.eup %2936  ;;  %v1371_v49 = vsel %vm91_vm0, %v3414_v16, 0.0 }
 0x1d0   :  { %2832 = vmatprep.subr.bf16.mxu1 %v2831_v4  ;;  %v3422_v52 = vpop.eup %2938  ;;  %v1372_v21 = vadd.f32 %v1371_v49, %v1370_v62  ;;  %v1373_v20 = vsel %vm91_vm0, %v3418_v17, 0.0 }
 0x1d1   :  { %v1356_v61 = vadd.f32 %v1355_v31, %v1354_v13  ;;  %v1367_v44 = vadd.f32 %v1366_v57, %v1365_v46  ;;  %2834 = vmatpush3.bf16.msra.mxu1 %v2831_v4  ;;  %2830 = vmatpush3.bf16.msra.mxu0 %v2827_v9  ;;  %v1375_v58 = vsel %vm91_vm0, %v3422_v52, 0.0 }
 0x1d2   :  { %2836 = vmatprep.subr.bf16.mxu1 %v2835_v18  ;;  %v3426_v24 = vpop.eup %2940  ;;  %v1374_v27 = vadd.f32 %v1373_v20, %v1372_v21  ;;  %v3484_v20 = vld [vmem:[#allocation3 + $0x88] sm:$0xff] }
 0x1d3   :  { %2948 = vrcp.f32 %v1356_v61  ;;  %v1368_v32 = vrot.slane %v1367_v44, 1  ;;  %v3428_v25 = vpop.eup %2942  ;;  %v1383_v0 = vsel %vm91_vm0, %v3426_v24, 0.0 }
 0x1d4   :  { %v3434_v53 = vpop.eup %2944  ;;  %v1376_v34 = vadd.f32 %v1375_v58, %v1374_v27  ;;  %v1384_v1 = vsel %vm91_vm0, %v3428_v25, 0.0  ;;  %2668 = vmatmul.mubr.msk.f32.vlgmr.msra.gmra.mrb[20].mxu0 %vm91_vm0, %v3438_v41 }
 0x1d5   :  { %v1369_v33 = vadd.f32 %v1368_v32, %v1367_v44  ;;  %2838 = vmatpush3.bf16.msra.mxu1 %v2835_v18  ;;  %v3442_v50 = vpop.eup %2946  ;;  %v1385_v3 = vadd.f32 %v1384_v1, %v1383_v0  ;;  %2670 = vmatprep.mubr.msk.f32.mxu0 %vm91_vm0, %v3444_v37  ;;  %v1386_v30 = vsel %vm91_vm0, %v3434_v53, 0.0  ;;  %v3500_v0 = vld [vmem:[#allocation3 + $0xb0] sm:$0xff] }
 0x1d6   :  { %v1377_v15 = vrot.slane %v1376_v34, 4  ;;  %v1388_v42 = vsel %vm91_vm0, %v3442_v50, 0.0 }
 0x1d7   :  { %2950 = vrcp.f32 %v1369_v33  ;;  %v1387_v39 = vadd.f32 %v1386_v30, %v1385_v3  ;;  %v3504_v33 = vld [vmem:[#allocation3 + $0x98] sm:$0xff]  ;;  %v3508_v3 = vld [vmem:[#allocation3 + $0xc0] sm:$0xff] }
 0x1d8   :  { %2682 = vmatmul.mubr.msk.f32.vlgmr.msra.gmra.mrb[20].mxu1 %vm91_vm0, %v3450_v40  ;;  %v1378_v54 = vadd.f32 %v1377_v15, %v1376_v34  ;;  %2671 = vmatmul.mubr.msk.f32.gmra.mrb[22].mxu0 %vm91_vm0, %v3460_v12 }
 0x1d9   :  { %2684 = vmatprep.mubr.msk.f32.mxu1 %vm91_vm0, %v3456_v45  ;;  %v1389_v29 = vadd.f32 %v1388_v42, %v1387_v39  ;;  %2695 = vmatprep.mubr.msk.f32.mxu0 %vm91_vm0, %v3464_v56  ;;  %v3520_v39 = vld [vmem:[#allocation3 + $0xe0] sm:$0xff] }
 0x1da   :  { %v1379_v43 = vrot.slane %v1378_v54, 2 }
 0x1db   :  { %v1390_v8 = vrot.slane %v1389_v29, 4 }
 0x1dc   :  { %2685 = vmatmul.mubr.msk.f32.gmra.mrb[22].mxu1 %vm91_vm0, %v3468_v48  ;;  %v1380_v63 = vadd.f32 %v1379_v43, %v1378_v54  ;;  %v3544_v43 = vld [vmem:[#allocation3 + $0xf8] sm:$0xff] }
 0x1dd   :  { %v2949_v55 = vpop.eup %2948  ;;  %2709 = vmatprep.mubr.msk.f32.mxu1 %vm91_vm0, %v3472_v2  ;;  %v1391_v38 = vadd.f32 %v1390_v8, %v1389_v29  ;;  %v3540_v29 = vld [vmem:[#allocation3 + $0xf0] sm:$0xff]  ;;  %v3551_v8 = vstv %s3659_s0  ;;  %s3039_s0 = smov [#allocation6]  }
 0x1de   :  { %v1420_v19 = vmul.f32 %v2949_v55, %v3338_v51  ;;  %v1421_v9 = vmul.f32 %v2949_v55, %v3340_v5  ;;  %v1422_v13 = vmul.f32 %v2949_v55, %v3344_v35  ;;  %v1381_v46 = vrot.slane %v1380_v63, 1  ;;  %s2315_s24 = sshll.u32 %s3039_s0, 4  ;;  %s2316_s24 = int_to_ptr.vmem [resolvable:$true] %s2315_s24 }
 0x1df   :  { %v1423_v60 = vmul.f32 %v2949_v55, %v3351_v10  ;;  %v1392_v14 = vrot.slane %v1391_v38, 2  ;;  %s3010_s25 = scalar_lea.vmem %s2316_s24, 4096  ;;  %p3015_p9 = scmp.lt.s32.totalorder %s2316_s24, %s2316_s24 }
 0x1e0   :  { %v2839_v4 = vpack.c.bf16 %v1421_v9, %v1420_v19  ;;  %v1382_v57 = vadd.f32 %v1381_v46, %v1380_v63  ;;  %v2983_v9 = vld [vmem:[#allocation3 + $0x8] sm:$0xff]  ;;  %p3011_p8 = scmp.ne.s32.totalorder %s2316_s24, %s3010_s25  ;;  %p3016_p10 = scmp.lt.s32.totalorder %s3010_s25, %s3010_s25 }
 0x1e1   :  { %v2951_v31 = vpop.eup %2950  ;;  %v2843_v62 = vpack.c.bf16 %v1423_v60, %v1422_v13  ;;  %v1393_v18 = vadd.f32 %v1392_v14, %v1391_v38  ;;  %v2984_v60 = vld [vmem:[#allocation3] sm:$0xff] }
 0x1e2   :  { %2840 = vmatprep.subr.bf16.mxu0 %v2839_v4  ;;  %v1424_v49 = vmul.f32 %v2951_v31, %v3356_v36  ;;  %v1425_v61 = vmul.f32 %v2951_v31, %v3360_v23  ;;  %v1426_v51 = vmul.f32 %v2951_v31, %v3364_v11  ;;  %2952 = vrcp.f32 %v1382_v57  ;;  %v3488_v36 = vld [vmem:[#allocation3 + $0x90] sm:$0xff]  ;;  %v3492_v11 = vld [vmem:[#allocation3 + $0xa8] sm:$0xff]  ;;  %p3017_p11 = por %p3016_p10, %p3015_p9 }
 0x1e3   :  { %2842 = vmatpush3.bf16.msra.mxu0 %v2839_v4  ;;  %v1427_v5 = vmul.f32 %v2951_v31, %v3372_v26  ;;  %v1394_v35 = vrot.slane %v1393_v18, 1 }
 0x1e4   :  { %v2847_v44 = vpack.c.bf16 %v1425_v61, %v1424_v49  ;;  %2844 = vmatprep.subr.bf16.mxu0 %v2843_v62  ;;  %p3018_p12 = pnand %p3017_p11, %p3011_p8 }
 0x1e5   :  { %v2851_v10 = vpack.c.bf16 %v1427_v5, %v1426_v51  ;;  %v1395_v21 = vadd.f32 %v1394_v35, %v1393_v18  ;;  %v2985_v35 = vld [vmem:[#allocation3 + $0x20] sm:$0xff] }
 0x1e6   :  { %2848 = vmatprep.subr.bf16.mxu1 %v2847_v44 }
 0x1e7   :  { %2850 = vmatpush3.bf16.msra.mxu1 %v2847_v44  ;;  %2846 = vmatpush3.bf16.msra.mxu0 %v2843_v62  ;;  %2954 = vrcp.f32 %v1395_v21  ;;  %v2986_v21 = vld [vmem:[#allocation3 + $0x10] sm:$0xff] }
 0x1e8   :  { %2852 = vmatprep.subr.bf16.mxu1 %v2851_v10 }
 0x1ea   :  { %2696 = vmatmul.mubr.msk.f32.vlgmr.msra.gmra.mrb[24].mxu0 %vm91_vm0, %v3484_v20 }
 0x1eb   :  { %2854 = vmatpush3.bf16.msra.mxu1 %v2851_v10  ;;  %2698 = vmatprep.mubr.msk.f32.mxu0 %vm91_vm0, %v3488_v36 }
 0x1ec   :  { %v2953_v23 = vpop.eup %2952 }
 0x1ed   :  { %v1428_v26 = vmul.f32 %v2953_v23, %v3408_v22  ;;  %v1429_v32 = vmul.f32 %v2953_v23, %v3414_v16  ;;  %v1430_v27 = vmul.f32 %v2953_v23, %v3418_v17  ;;  %v1431_v58 = vmul.f32 %v2953_v23, %v3422_v52  ;;  %v3512_v16 = vld [vmem:[#allocation3 + $0xb8] sm:$0xff] }
 0x1ee   :  { %2710 = vmatmul.mubr.msk.f32.vlgmr.msra.gmra.mrb[24].mxu1 %vm91_vm0, %v3492_v11  ;;  %2699 = vmatmul.mubr.msk.f32.gmra.mrb[26].mxu0 %vm91_vm0, %v3504_v33 }
 0x1ef   :  { %2712 = vmatprep.mubr.msk.f32.mxu1 %vm91_vm0, %v3500_v0  ;;  %v2855_v34 = vpack.c.bf16 %v1429_v32, %v1428_v26  ;;  %v2859_v1 = vpack.c.bf16 %v1431_v58, %v1430_v27  ;;  %2723 = vmatprep.mubr.msk.f32.mxu0 %vm91_vm0, %v3508_v3 }
 0x1f1   :  { %v2955_v22 = vpop.eup %2954  ;;  %2856 = vmatprep.subr.bf16.mxu0 %v2855_v34 }
 0x1f2   :  { %2713 = vmatmul.mubr.msk.f32.gmra.mrb[26].mxu1 %vm91_vm0, %v3512_v16  ;;  %v1432_v17 = vmul.f32 %v2955_v22, %v3426_v24  ;;  %v1433_v52 = vmul.f32 %v2955_v22, %v3428_v25  ;;  %2858 = vmatpush3.bf16.msra.mxu0 %v2855_v34  ;;  %v1434_v15 = vmul.f32 %v2955_v22, %v3434_v53  ;;  %v3524_v24 = vld [vmem:[#allocation3 + $0xc8] sm:$0xff]  ;;  %v3528_v25 = vld [vmem:[#allocation3 + $0xd0] sm:$0xff]  ;;  %v3532_v53 = vld [vmem:[#allocation3 + $0xd8] sm:$0xff] }
 0x1f3   :  { %v1435_v30 = vmul.f32 %v2955_v22, %v3442_v50  ;;  %2860 = vmatprep.subr.bf16.mxu0 %v2859_v1  ;;  %2737 = vmatprep.mubr.msk.f32.mxu1 %vm91_vm0, %v3520_v39  ;;  %v3536_v50 = vld [vmem:[#allocation3 + $0xe8] sm:$0xff] }
 0x1f4   :  { %v2863_v54 = vpack.c.bf16 %v1433_v52, %v1432_v17 }
 0x1f5   :  { %v2867_v42 = vpack.c.bf16 %v1435_v30, %v1434_v15  ;;  %v2987_v30 = vld [vmem:[#allocation3 + $0x40] sm:$0xff] }
 0x1f6   :  { %2864 = vmatprep.subr.bf16.mxu1 %v2863_v54  ;;  %2862 = vmatpush3.bf16.msra.mxu0 %v2859_v1 }
 0x1f7   :  { %2866 = vmatpush3.bf16.msra.mxu1 %v2863_v54 }
 0x1f8   :  { %2868 = vmatprep.subr.bf16.mxu1 %v2867_v42 }
 0x1f9   :  { %2724 = vmatmul.mubr.msk.f32.vlgmr.msra.gmra.mrb[28].mxu0 %vm91_vm0, %v3524_v24 }
 0x1fa   :  { %2726 = vmatprep.mubr.msk.f32.mxu0 %vm91_vm0, %v3528_v25 }
 0x1fb   :  { %2870 = vmatpush3.bf16.msra.mxu1 %v2867_v42 }
 0x1fd   :  { %2727 = vmatmul.mubr.msk.f32.gmra.mrb[30].mxu0 %vm91_vm0, %v3532_v53 }
 0x1fe   :  { %2738 = vmatmul.mubr.msk.f32.vlgmr.msra.gmra.mrb[28].mxu1 %vm91_vm0, %v3536_v50 }
 0x1ff   :  { %2740 = vmatprep.mubr.msk.f32.mxu1 %vm91_vm0, %v3540_v29 }
 0x202   :  { %2741 = vmatmul.mubr.msk.f32.gmra.mrb[30].mxu1 %vm91_vm0, %v3544_v43 }
 0x297   :  { %v2641_v55 = vpop.f32.mrb[16].mxu0 }
 0x298   :  { %v2215_v63 = vmul.f32 %v2641_v55, %v3551_v8  ;;  %v1514_v38 = vpop.f32.mrb[17].mxu0 }
 0x299   :  { %v2214_v19 = vmul.f32 %v3551_v8, %v1514_v38 }
 0x29a   :  { %v2247_v13 = vadd.f32 %v2983_v9, %v2215_v63  ;;  %v2655_v46 = vpop.f32.mrb[16].mxu1 }
 0x29b   :  { %v2246_v14 = vadd.f32 %v2984_v60, %v2214_v19  ;;  %v2644_v4 = vpop.f32.mrb[18].mxu0  ;;  %v2219_v31 = vmul.f32 %v2655_v46, %v3551_v8  ;;  %v1611_v57 = vpop.f32.mrb[17].mxu1 }
 0x29c   :  { %2279 = vst.msk [vmem:[#allocation6 + $0x8] sm:$0xff] %vm91_vm0, %v2247_v13  ;;  %v2217_v62 = vmul.f32 %v2644_v4, %v3551_v8  ;;  %v1524_v18 = vpop.f32.mrb[19].mxu0  ;;  %v2218_v49 = vmul.f32 %v3551_v8, %v1611_v57 }
 0x29d   :  { %2278 = vst.msk [vmem:[#allocation6] sm:$0xff] %vm91_vm0, %v2246_v14  ;;  %v2216_v61 = vmul.f32 %v3551_v8, %v1524_v18  ;;  %v2251_v51 = vadd.f32 %v3383_v59, %v2219_v31 }
 0x29e   :  { %v2249_v5 = vadd.f32 %v3387_v6, %v2217_v62  ;;  %v2250_v44 = vadd.f32 %v2985_v35, %v2218_v49  ;;  %v2658_v10 = vpop.f32.mrb[18].mxu1 }
 0x29f   :  { %v2248_v23 = vadd.f32 %v2986_v21, %v2216_v61  ;;  %2283 = vst.msk [vmem:[#allocation6 + $0x28] sm:$0xff] %vm91_vm0, %v2251_v51  ;;  %v2221_v26 = vmul.f32 %v2658_v10, %v3551_v8  ;;  %v1621_v32 = vpop.f32.mrb[19].mxu1 }
 0x2a0   :  { %2281 = vst.msk [vmem:[#allocation6 + $0x18] sm:$0xff] %vm91_vm0, %v2249_v5  ;;  %2282 = vst.msk [vmem:[#allocation6 + $0x20] sm:$0xff] %vm91_vm0, %v2250_v44  ;;  %v2220_v59 = vmul.f32 %v3551_v8, %v1621_v32 }
 0x2a1   :  { %2280 = vst.msk [vmem:[#allocation6 + $0x10] sm:$0xff] %vm91_vm0, %v2248_v23  ;;  %v2253_v6 = vadd.f32 %v3402_v28, %v2221_v26 }
 0x2a2   :  { %v2252_v27 = vadd.f32 %v3392_v47, %v2220_v59 }
 0x2a3   :  { %2285 = vst.msk [vmem:[#allocation6 + $0x38] sm:$0xff] %vm91_vm0, %v2253_v6 }
 0x2a4   :  { %2284 = vst.msk [vmem:[#allocation6 + $0x30] sm:$0xff] %vm91_vm0, %v2252_v27 }
 0x2a7   :  { %v2669_v58 = vpop.f32.mrb[20].mxu0 }
 0x2a8   :  { %v2223_v34 = vmul.f32 %v2669_v58, %v3551_v8  ;;  %v1708_v1 = vpop.f32.mrb[21].mxu0 }
 0x2a9   :  { %v2222_v22 = vmul.f32 %v3551_v8, %v1708_v1 }
 0x2aa   :  { %v2255_v17 = vadd.f32 %v3438_v41, %v2223_v34 }
 0x2ab   :  { %v2683_v52 = vpop.f32.mrb[20].mxu1  ;;  %v2254_v54 = vadd.f32 %v2987_v30, %v2222_v22  ;;  %v2672_v42 = vpop.f32.mrb[22].mxu0 }
 0x2ac   :  { %v2227_v15 = vmul.f32 %v2683_v52, %v3551_v8  ;;  %v1805_v28 = vpop.f32.mrb[21].mxu1  ;;  %2287 = vst.msk [vmem:[#allocation6 + $0x48] sm:$0xff] %vm91_vm0, %v2255_v17  ;;  %v2225_v55 = vmul.f32 %v2672_v42, %v3551_v8  ;;  %v1718_v63 = vpop.f32.mrb[23].mxu0 }
 0x2ad   :  { %v2226_v47 = vmul.f32 %v3551_v8, %v1805_v28  ;;  %2286 = vst.msk [vmem:[#allocation6 + $0x40] sm:$0xff] %vm91_vm0, %v2254_v54  ;;  %v2224_v41 = vmul.f32 %v3551_v8, %v1718_v63 }
 0x2ae   :  { %v2259_v38 = vadd.f32 %v3450_v40, %v2227_v15  ;;  %v2257_v9 = vadd.f32 %v3460_v12, %v2225_v55 }
 0x2af   :  { %v2258_v19 = vadd.f32 %v3410_v7, %v2226_v47  ;;  %v2686_v13 = vpop.f32.mrb[22].mxu1  ;;  %v2256_v60 = vadd.f32 %v3444_v37, %v2224_v41 }
 0x2b0   :  { %2291 = vst.msk [vmem:[#allocation6 + $0x68] sm:$0xff] %vm91_vm0, %v2259_v38  ;;  %v2229_v46 = vmul.f32 %v2686_v13, %v3551_v8  ;;  %v1815_v14 = vpop.f32.mrb[23].mxu1  ;;  %2289 = vst.msk [vmem:[#allocation6 + $0x58] sm:$0xff] %vm91_vm0, %v2257_v9 }
 0x2b1   :  { %2290 = vst.msk [vmem:[#allocation6 + $0x60] sm:$0xff] %vm91_vm0, %v2258_v19  ;;  %v2228_v40 = vmul.f32 %v3551_v8, %v1815_v14  ;;  %2288 = vst.msk [vmem:[#allocation6 + $0x50] sm:$0xff] %vm91_vm0, %v2256_v60 }
 0x2b2   :  { %v2261_v4 = vadd.f32 %v3468_v48, %v2229_v46 }
 0x2b3   :  { %v2260_v7 = vadd.f32 %v3456_v45, %v2228_v40 }
 0x2b4   :  { %2293 = vst.msk [vmem:[#allocation6 + $0x78] sm:$0xff] %vm91_vm0, %v2261_v4 }
 0x2b5   :  { %2292 = vst.msk [vmem:[#allocation6 + $0x70] sm:$0xff] %vm91_vm0, %v2260_v7 }
 0x2bd   :  { %v2697_v12 = vpop.f32.mrb[24].mxu0 }
 0x2be   :  { %v2231_v37 = vmul.f32 %v2697_v12, %v3551_v8  ;;  %v1902_v31 = vpop.f32.mrb[25].mxu0 }
 0x2bf   :  { %v2230_v57 = vmul.f32 %v3551_v8, %v1902_v31 }
 0x2c0   :  { %v2263_v62 = vadd.f32 %v3484_v20, %v2231_v37 }
 0x2c1   :  { %v2711_v18 = vpop.f32.mrb[24].mxu1  ;;  %v2262_v49 = vadd.f32 %v3464_v56, %v2230_v57  ;;  %v2700_v61 = vpop.f32.mrb[26].mxu0 }
 0x2c2   :  { %2295 = vst.msk [vmem:[#allocation6 + $0x88] sm:$0xff] %vm91_vm0, %v2263_v62  ;;  %v2235_v48 = vmul.f32 %v2711_v18, %v3551_v8  ;;  %v1999_v45 = vpop.f32.mrb[25].mxu1  ;;  %v2233_v5 = vmul.f32 %v2700_v61, %v3551_v8  ;;  %v1912_v35 = vpop.f32.mrb[27].mxu0 }
 0x2c3   :  { %2294 = vst.msk [vmem:[#allocation6 + $0x80] sm:$0xff] %vm91_vm0, %v2262_v49  ;;  %v2234_v51 = vmul.f32 %v3551_v8, %v1999_v45  ;;  %v2232_v20 = vmul.f32 %v3551_v8, %v1912_v35 }
 0x2c4   :  { %v2267_v44 = vadd.f32 %v3492_v11, %v2235_v48  ;;  %v2265_v56 = vadd.f32 %v3504_v33, %v2233_v5 }
 0x2c5   :  { %v2266_v10 = vadd.f32 %v3472_v2, %v2234_v51  ;;  %v2714_v21 = vpop.f32.mrb[26].mxu1  ;;  %v2264_v26 = vadd.f32 %v3488_v36, %v2232_v20 }
 0x2c6   :  { %2299 = vst.msk [vmem:[#allocation6 + $0xa8] sm:$0xff] %vm91_vm0, %v2267_v44  ;;  %v2237_v23 = vmul.f32 %v2714_v21, %v3551_v8  ;;  %v2009_v32 = vpop.f32.mrb[27].mxu1  ;;  %2297 = vst.msk [vmem:[#allocation6 + $0x98] sm:$0xff] %vm91_vm0, %v2265_v56 }
 0x2c7   :  { %2298 = vst.msk [vmem:[#allocation6 + $0xa0] sm:$0xff] %vm91_vm0, %v2266_v10  ;;  %v2236_v11 = vmul.f32 %v3551_v8, %v2009_v32  ;;  %2296 = vst.msk [vmem:[#allocation6 + $0x90] sm:$0xff] %vm91_vm0, %v2264_v26 }
 0x2c8   :  { %v2269_v59 = vadd.f32 %v3512_v16, %v2237_v23 }
 0x2c9   :  { %v2268_v2 = vadd.f32 %v3500_v0, %v2236_v11 }
 0x2ca   :  { %2301 = vst.msk [vmem:[#allocation6 + $0xb8] sm:$0xff] %vm91_vm0, %v2269_v59 }
 0x2cb   :  { %2300 = vst.msk [vmem:[#allocation6 + $0xb0] sm:$0xff] %vm91_vm0, %v2268_v2 }
 0x2cc   :  { %v2725_v33 = vpop.f32.mrb[28].mxu0 }
 0x2cd   :  { %v2239_v36 = vmul.f32 %v2725_v33, %v3551_v8  ;;  %v2096_v6 = vpop.f32.mrb[29].mxu0 }
 0x2ce   :  { %v2238_v27 = vmul.f32 %v3551_v8, %v2096_v6 }
 0x2cf   :  { %v2271_v58 = vadd.f32 %v3524_v24, %v2239_v36 }
 0x2d0   :  { %v2270_v34 = vadd.f32 %v3508_v3, %v2238_v27  ;;  %v2728_v1 = vpop.f32.mrb[30].mxu0 }
 0x2d1   :  { %2303 = vst.msk [vmem:[#allocation6 + $0xc8] sm:$0xff] %vm91_vm0, %v2271_v58  ;;  %v2739_v16 = vpop.f32.mrb[28].mxu1  ;;  %v2241_v0 = vmul.f32 %v2728_v1, %v3551_v8  ;;  %v2106_v22 = vpop.f32.mrb[31].mxu0 }
 0x2d2   :  { %v2243_v17 = vmul.f32 %v2739_v16, %v3551_v8  ;;  %2302 = vst.msk [vmem:[#allocation6 + $0xc0] sm:$0xff] %vm91_vm0, %v2270_v34  ;;  %v2193_v52 = vpop.f32.mrb[29].mxu1  ;;  %v2240_v15 = vmul.f32 %v3551_v8, %v2106_v22 }
 0x2d3   :  { %v2242_v30 = vmul.f32 %v3551_v8, %v2193_v52  ;;  %v2273_v24 = vadd.f32 %v3532_v53, %v2241_v0 }
 0x2d4   :  { %v2275_v3 = vadd.f32 %v3536_v50, %v2243_v17  ;;  %v2272_v54 = vadd.f32 %v3528_v25, %v2240_v15 }
 0x2d5   :  { %v2274_v28 = vadd.f32 %v3520_v39, %v2242_v30  ;;  %2305 = vst.msk [vmem:[#allocation6 + $0xd8] sm:$0xff] %vm91_vm0, %v2273_v24  ;;  %v2742_v42 = vpop.f32.mrb[30].mxu1 }
 0x2d6   :  { %2307 = vst.msk [vmem:[#allocation6 + $0xe8] sm:$0xff] %vm91_vm0, %v2275_v3  ;;  %v2245_v47 = vmul.f32 %v2742_v42, %v3551_v8  ;;  %2304 = vst.msk [vmem:[#allocation6 + $0xd0] sm:$0xff] %vm91_vm0, %v2272_v54  ;;  %v2203_v55 = vpop.f32.mrb[31].mxu1 }
 0x2d7   :  { %2306 = vst.msk [vmem:[#allocation6 + $0xe0] sm:$0xff] %vm91_vm0, %v2274_v28  ;;  %v2244_v53 = vmul.f32 %v3551_v8, %v2203_v55 }
 0x2d8   :  { %v2277_v25 = vadd.f32 %v3544_v43, %v2245_v47 }
 0x2d9   :  { %v2276_v39 = vadd.f32 %v3540_v29, %v2244_v53 }
 0x2da   :  { %2309 = vst.msk [vmem:[#allocation6 + $0xf8] sm:$0xff] %vm91_vm0, %v2277_v25 }
 0x2db   :  { %2308 = vst.msk [vmem:[#allocation6 + $0xf0] sm:$0xff] %vm91_vm0, %v2276_v39 }
 0x2dc   :  { %3021 = shalt.err (!%p3018_p12)
}
 0x2dd   :  { %s3022_s28 = scalar_lea.hbm %s3661_s2, 4096 }
 0x2de   :  { %p3023_p13 = scmp.ne.s32.totalorder %s3661_s2, %s3022_s28  ;;  %p3026_p0 = scmp.lt.u32.totalorder %s3022_s28, %s3661_s2 }
 0x2e0   :  { %p3028_p1 = pnand %p3026_p0, %p3023_p13 }
 0x2e2   :  { %3031 = shalt.err (!%p3028_p1)
}
 0x2e3   :  { %2321 = dma.vmem_to_hbm [thread:$0]  %s2316_s24, 4096, %s3661_s2, [#allocation5], %s3037_s19, %s3037_s19, %s3038_s20  }
 0x2e4   :  { %3034 = dma.done.wait [#allocation5], 4096  }
 0x2e5   :  { %3035 = vsyncadd [#allocation5], 4294963200 }
 0x2e6   :  { %2325 = vsyncpa [#allocation4], 1 }
 0x2e7   :  { %2326 = vsyncpa [#allocation5], 1 }

</bundles_post_ra>
